<compile_context>
chip_gen: v7x
topology: tpu7x:2x2x1
jax: 0.10.0
libtpu: 0.0.40
codegen_flags: <defaults>
</compile_context>

<pallas_src>
import jax
import jax.numpy as jnp
from jax.experimental import pallas as pl
from jax.experimental.pallas import tpu as pltpu

FEATURE_SIZE = 256  # lin_5 consumes a 256-dim input, so x must be (..., 256)
OUT = 3


def render_epilogue_kernel(x_ref, w5_ref, color_ref):
    # Pure streaming matmul: (tile_n, 256) @ (256, 3), f32 accumulation on MXU.
    color_ref[...] = jnp.dot(
        x_ref[...], w5_ref[...], preferred_element_type=jnp.float32
    ).astype(color_ref.dtype)


def render_mlp_epilogue(x, w5, *, tile_n=8192, vmem_limit_bytes=None):
    """Compute color = x @ w5.

    x:  (N, 256).  w5: (256, 3), already transposed from PyTorch's (3, 256).

    The module's lin_3 / lin_4 weights are dead code in forward() and are
    intentionally not part of this kernel.

    tile_n guidance: 8192 (default) for v6e / v7x; 4096 for v5e, or keep 8192
    on v5e with vmem_limit_bytes=48<<20.  On v7x pick tile_n so the grid has
    >= 4 steps when N is large enough, so both TensorCores get work.
    """
    N, F = x.shape
    assert F == FEATURE_SIZE
    assert w5.shape == (FEATURE_SIZE, OUT)

    # dtype-dependent minimum sublane tile: f32 -> 8, bf16 -> 16, int8/fp8 -> 32.
    x_itemsize = jnp.dtype(x.dtype).itemsize
    min_rows = {4: 8, 2: 16, 1: 32}.get(x_itemsize, 8)

    # Round tile_n down to a multiple of min_rows (but at least min_rows), then
    # clamp so we never allocate a tile much larger than the problem itself.
    tile_n = max(min_rows, (tile_n // min_rows) * min_rows)
    n_ceil = pl.cdiv(max(N, 1), min_rows) * min_rows
    tile_n = min(tile_n, n_ceil)

    grid = (pl.cdiv(N, tile_n),)

    # Accurate, unpadded traffic estimate (advisory scheduler hint only).
    cost = pl.CostEstimate(
        flops=2 * N * FEATURE_SIZE * OUT,
        transcendentals=0,
        bytes_accessed=(
            N * FEATURE_SIZE * x_itemsize                        # x read
            + FEATURE_SIZE * OUT * jnp.dtype(w5.dtype).itemsize  # W5 read
            + N * OUT * x_itemsize                               # color write
        ),
    )

    return pl.pallas_call(
        render_epilogue_kernel,
        out_shape=jax.ShapeDtypeStruct((N, OUT), x.dtype),
        grid_spec=pl.GridSpec(
            grid=grid,
            in_specs=[
                pl.BlockSpec((tile_n, F), lambda i: (i, 0)),  # x row-tile (streamed)
                pl.BlockSpec((F, OUT), lambda i: (0, 0)),     # W5 (VMEM-resident)
            ],
            out_specs=pl.BlockSpec((tile_n, OUT), lambda i: (i, 0)),
        ),
        compiler_params=pltpu.CompilerParams(
            dimension_semantics=("parallel",),
            vmem_limit_bytes=vmem_limit_bytes,
        ),
        cost_estimate=cost,
    )(x, w5)


if __name__ == "__main__":
    key = jax.random.PRNGKey(0)
    k_x, k5 = jax.random.split(key, 2)

    # Small batch of "pixels"/rays; deliberately NOT a power of two.
    N = 200
    x = jax.random.normal(k_x, (N, FEATURE_SIZE), dtype=jnp.float32)

    # lin_5 weight stored as (in, out) for `x @ W`.
    w5 = jax.random.normal(k5, (FEATURE_SIZE, OUT), dtype=jnp.float32) * 0.05

    # Reference: the PyTorch forward returns exactly lin_5(x).
    ref = x @ w5

    # 1) Default large-tile path (single grid step, tile clamped to ~N).
    color = jax.block_until_ready(render_mlp_epilogue(x, w5))
    assert color.shape == (N, OUT)
    assert jnp.allclose(color, ref, atol=1e-4, rtol=1e-4)

    # 2) Multi-step path with a ragged tail block (200 = 3*64 + 8) to exercise
    #    the no-pad bounds-clipped tail handling.
    color2 = jax.block_until_ready(render_mlp_epilogue(x, w5, tile_n=64))
    assert color2.shape == (N, OUT)
    assert jnp.allclose(color2, ref, atol=1e-4, rtol=1e-4)

    print("KERNEL_OK")
</pallas_src>

<mosaic_0001>
module attributes {stable_mosaic.version = 11 : i64} {
  func.func @render_epilogue_kernel(%arg0: i32, %arg1: memref<200x256xf32, #tpu.memory_space<vmem>>, %arg2: memref<256x3xf32, #tpu.memory_space<vmem>>, %arg3: memref<200x3xf32, #tpu.memory_space<vmem>>) attributes {dimension_semantics = [#tpu.dimension_semantics<parallel>], iteration_bounds = array<i64: 1>, scalar_prefetch = 0 : i64, scratch_operands = 0 : i64, tpu.core_type = #tpu.core_type<tc>, window_params = [{transform_indices = @transform_0, window_bounds = array<i64: 200, 256>}, {pipeline_mode = #tpu.pipeline_mode<synchronous>, transform_indices = @transform_1, window_bounds = array<i64: 256, 3>}, {transform_indices = @transform_2, window_bounds = array<i64: 200, 3>}]} {
    %c0 = arith.constant 0 : index
    %c0_0 = arith.constant 0 : index
    %0 = vector.load %arg1[%c0, %c0_0] : memref<200x256xf32, #tpu.memory_space<vmem>>, vector<200x256xf32>
    %c0_1 = arith.constant 0 : index
    %c0_2 = arith.constant 0 : index
    %1 = vector.load %arg2[%c0_1, %c0_2] : memref<256x3xf32, #tpu.memory_space<vmem>>, vector<256x3xf32>
    %cst = arith.constant dense<0.000000e+00> : vector<200x3xf32>
    %2 = tpu.matmul %0, %1, %cst {dimension_numbers = #tpu.dot_dimension_numbers<[1], [0], [0], [1], [0, 0, 1, 1], [], []>} : vector<200x256xf32>, vector<256x3xf32>, vector<200x3xf32> -> vector<200x3xf32>
    %c0_3 = arith.constant 0 : index
    %c0_4 = arith.constant 0 : index
    %3 = vector.load %arg3[%c0_3, %c0_4] : memref<200x3xf32, #tpu.memory_space<vmem>>, vector<200x3xf32>
    tpu.vector_store %arg3[%c0_3, %c0_4], %2 {strides = array<i32>} : memref<200x3xf32, #tpu.memory_space<vmem>>, vector<200x3xf32>,
    return
  }
  func.func @transform_0(%arg0: i32) -> (i32, i32) {
    %c0_i32 = arith.constant 0 : i32
    %c0_i32_0 = arith.constant 0 : i32
    return %arg0, %c0_i32 : i32, i32
  }
  func.func @transform_1(%arg0: i32) -> (i32, i32) {
    %c0_i32 = arith.constant 0 : i32
    %c0_i32_0 = arith.constant 0 : i32
    %c0_i32_1 = arith.constant 0 : i32
    return %c0_i32, %c0_i32_0 : i32, i32
  }
  func.func @transform_2(%arg0: i32) -> (i32, i32) {
    %c0_i32 = arith.constant 0 : i32
    %c0_i32_0 = arith.constant 0 : i32
    return %arg0, %c0_i32 : i32, i32
  }
}

</mosaic_0001>

<bundles_post_ra>
// kernel: tpu_custom_call.1
= control target key start
LH: loop header
LB: loop body
LE: loop exit
PB: predicated region body
PF: predicated region fallthrough
CT: control target
= control target key end

     0   :  { %7 = vsyncpa [#allocation3], 0  ;;  %s436_s9 = smov [#allocation2]   ;;  %s695_s0 = inlined_call_operand.hbm [shape: f32[200,256], index: 0, kind: input, shape index: {}]   ;;  %s696_s1 = inlined_call_operand.vmem [shape: f32[256,3], index: 1, kind: input, shape index: {}]   ;;  %s697_s2 = inlined_call_operand.vmem [shape: f32[200,3], index: 2, kind: output, shape index: {}]  }
   0x1   :  { %s13_s10 = sshll.u32 %s436_s9, 4  ;;  %s412_s13 = scalar_lea.hbm %s695_s0, 6400  ;;  %s14_s10 = int_to_ptr.vmem [resolvable:$true] %s13_s10 }
   0x2   :  { %p413_p0 = scmp.ne.s32.totalorder %s695_s0, %s412_s13  ;;  %p416_p1 = scmp.lt.u32.totalorder %s412_s13, %s695_s0 }
   0x4   :  { %p418_p2 = pnand %p416_p1, %p413_p0 }
   0x6   :  { %421 = shalt.err (!%p418_p2)
}
   0x7   :  { %s422_s18 = scalar_lea.vmem %s14_s10, 6400  ;;  %p427_p4 = scmp.lt.s32.totalorder %s14_s10, %s14_s10 }
   0x8   :  { %p423_p3 = scmp.ne.s32.totalorder %s14_s10, %s422_s18  ;;  %p428_p5 = scmp.lt.s32.totalorder %s422_s18, %s422_s18 }
   0xa   :  { %p429_p6 = por %p428_p5, %p427_p4 }
   0xc   :  { %p430_p7 = pnand %p429_p6, %p423_p3 }
   0xe   :  { %433 = shalt.err (!%p430_p7)
}
   0xf   :  { %s437_s19 = smov 256   ;;  %s438_s20 = smov 16  }
  0x10   :  { %19 = dma.hbm_to_vmem [thread:$0]  %s695_s0, 6400, %s14_s10, [#allocation3], %s437_s19, %s437_s19, %s438_s20  }
  0x11   :  { %434 = dma.done.wait [#allocation3], 6400  }
  0x12   :  { %435 = vsyncadd [#allocation3], 4294960896  ;;  %v439_v0 = vmov 0.0|0.0   ;;  %v75_v1 = vld [vmem:[%s696_s1] sm:$0xff]  ;;  %v76_v2 = vld [vmem:[%s696_s1 + $0x8] sm:$0xff]  ;;  %vm297_vm0 = vcmask 23552  }
  0x13   :  { %328 = vmatprep.subr.bf16.mxu0 %v439_v0  ;;  %376 = vmatprep.subr.bf16.mxu1 %v439_v0  ;;  %v77_v3 = vld [vmem:[%s696_s1 + $0x10] sm:$0xff]  ;;  %v329_v4 = vpack.c.bf16 %v76_v2, %v75_v1  ;;  %v78_v5 = vld [vmem:[%s696_s1 + $0x18] sm:$0xff]  ;;  %v79_v7 = vld [vmem:[%s696_s1 + $0x20] sm:$0xff] }
  0x14   :  { %v332_v6 = vpack.c.bf16 %v78_v5, %v77_v3  ;;  %v80_v8 = vld [vmem:[%s696_s1 + $0x28] sm:$0xff]  ;;  %v81_v10 = vld [vmem:[%s696_s1 + $0x30] sm:$0xff]  ;;  %v82_v11 = vld [vmem:[%s696_s1 + $0x38] sm:$0xff] }
  0x15   :  { %330 = vmatpush1.bf16.msra.mxu0 %v329_v4  ;;  %392 = vmatpush1.bf16.msra.mxu1 %v329_v4  ;;  %v335_v9 = vpack.c.bf16 %v80_v8, %v79_v7  ;;  %v26_v12 = vld [vmem:[#allocation2 + $0x8] sm:$0xff]  ;;  %v338_v13 = vpack.c.bf16 %v82_v11, %v81_v10  ;;  %v52_v14 = vld [vmem:[#allocation2 + $0xd8] sm:$0xff]  ;;  %v83_v15 = vld [vmem:[%s696_s1 + $0x40] sm:$0xff] }
  0x16   :  { %331 = vmatprep.subr.bf16.mxu0 %v439_v0  ;;  %377 = vmatprep.subr.bf16.mxu1 %v439_v0  ;;  %v84_v16 = vld [vmem:[%s696_s1 + $0x48] sm:$0xff]  ;;  %v85_v18 = vld [vmem:[%s696_s1 + $0x50] sm:$0xff]  ;;  %v86_v19 = vld [vmem:[%s696_s1 + $0x58] sm:$0xff] }
  0x17   :  { %171 = vmatprep.mubr.f32.mxu0 %v26_v12  ;;  %236 = vmatprep.mubr.f32.mxu1 %v52_v14  ;;  %v341_v17 = vpack.c.bf16 %v84_v16, %v83_v15  ;;  %v344_v20 = vpack.c.bf16 %v86_v19, %v85_v18  ;;  %v87_v21 = vld [vmem:[%s696_s1 + $0x60] sm:$0xff]  ;;  %v88_v22 = vld [vmem:[%s696_s1 + $0x68] sm:$0xff]  ;;  %v89_v24 = vld [vmem:[%s696_s1 + $0x70] sm:$0xff] }
  0x18   :  { %v347_v23 = vpack.c.bf16 %v88_v22, %v87_v21  ;;  %v90_v25 = vld [vmem:[%s696_s1 + $0x78] sm:$0xff]  ;;  %v91_v27 = vld [vmem:[%s696_s1 + $0x80] sm:$0xff]  ;;  %v92_v28 = vld [vmem:[%s696_s1 + $0x88] sm:$0xff] }
  0x19   :  { %333 = vmatpush1.bf16.msra.mxu0 %v332_v6  ;;  %393 = vmatpush1.bf16.msra.mxu1 %v332_v6  ;;  %v350_v26 = vpack.c.bf16 %v90_v25, %v89_v24  ;;  %v353_v29 = vpack.c.bf16 %v92_v28, %v91_v27  ;;  %v93_v30 = vld [vmem:[%s696_s1 + $0x90] sm:$0xff]  ;;  %v94_v31 = vld [vmem:[%s696_s1 + $0x98] sm:$0xff]  ;;  %v95_v33 = vld [vmem:[%s696_s1 + $0xa0] sm:$0xff] }
  0x1a   :  { %334 = vmatprep.subr.bf16.mxu0 %v439_v0  ;;  %378 = vmatprep.subr.bf16.mxu1 %v439_v0  ;;  %v356_v32 = vpack.c.bf16 %v94_v31, %v93_v30  ;;  %v96_v34 = vld [vmem:[%s696_s1 + $0xa8] sm:$0xff]  ;;  %v97_v36 = vld [vmem:[%s696_s1 + $0xb0] sm:$0xff]  ;;  %v98_v37 = vld [vmem:[%s696_s1 + $0xb8] sm:$0xff] }
  0x1b   :  { %v359_v35 = vpack.c.bf16 %v96_v34, %v95_v33  ;;  %v362_v38 = vpack.c.bf16 %v98_v37, %v97_v36  ;;  %v99_v39 = vld [vmem:[%s696_s1 + $0xc0] sm:$0xff]  ;;  %v100_v40 = vld [vmem:[%s696_s1 + $0xc8] sm:$0xff]  ;;  %v101_v42 = vld [vmem:[%s696_s1 + $0xd0] sm:$0xff] }
  0x1c   :  { %v365_v41 = vpack.c.bf16 %v100_v40, %v99_v39  ;;  %v102_v43 = vld [vmem:[%s696_s1 + $0xd8] sm:$0xff]  ;;  %v103_v45 = vld [vmem:[%s696_s1 + $0xe0] sm:$0xff]  ;;  %v104_v46 = vld [vmem:[%s696_s1 + $0xe8] sm:$0xff] }
  0x1d   :  { %336 = vmatpush1.bf16.msra.mxu0 %v335_v9  ;;  %394 = vmatpush1.bf16.msra.mxu1 %v335_v9  ;;  %v368_v44 = vpack.c.bf16 %v102_v43, %v101_v42  ;;  %v371_v47 = vpack.c.bf16 %v104_v46, %v103_v45  ;;  %v105_v48 = vld [vmem:[%s696_s1 + $0xf0] sm:$0xff]  ;;  %v106_v49 = vld [vmem:[%s696_s1 + $0xf8] sm:$0xff]  ;;  %v25_v51 = vld [vmem:[#allocation2] sm:$0xff] }
  0x1e   :  { %337 = vmatprep.subr.bf16.mxu0 %v439_v0  ;;  %379 = vmatprep.subr.bf16.mxu1 %v439_v0  ;;  %v374_v50 = vpack.c.bf16 %v106_v49, %v105_v48  ;;  %v51_v52 = vld [vmem:[#allocation2 + $0xd0] sm:$0xff]  ;;  %v28_v53 = vld [vmem:[#allocation2 + $0x18] sm:$0xff]  ;;  %v54_v54 = vld [vmem:[#allocation2 + $0xe8] sm:$0xff] }
  0x1f   :  { %v27_v55 = vld [vmem:[#allocation2 + $0x10] sm:$0xff]  ;;  %v53_v56 = vld [vmem:[#allocation2 + $0xe0] sm:$0xff]  ;;  %v30_v57 = vld [vmem:[#allocation2 + $0x28] sm:$0xff] }
  0x20   :  { %v56_v58 = vld [vmem:[#allocation2 + $0xf8] sm:$0xff]  ;;  %v29_v59 = vld [vmem:[#allocation2 + $0x20] sm:$0xff]  ;;  %v55_v60 = vld [vmem:[#allocation2 + $0xf0] sm:$0xff] }
  0x21   :  { %339 = vmatpush1.bf16.msra.mxu0 %v338_v13  ;;  %395 = vmatpush1.bf16.msra.mxu1 %v338_v13  ;;  %v32_v61 = vld [vmem:[#allocation2 + $0x38] sm:$0xff]  ;;  %v58_v62 = vld [vmem:[#allocation2 + $0x108] sm:$0xff]  ;;  %v31_v63 = vld [vmem:[#allocation2 + $0x30] sm:$0xff] }
  0x22   :  { %340 = vmatprep.subr.bf16.mxu0 %v439_v0  ;;  %380 = vmatprep.subr.bf16.mxu1 %v439_v0  ;;  %v34_v1 = vld [vmem:[#allocation2 + $0x48] sm:$0xff]  ;;  %v60_v2 = vld [vmem:[#allocation2 + $0x118] sm:$0xff]  ;;  %v33_v3 = vld [vmem:[#allocation2 + $0x40] sm:$0xff] }
  0x23   :  { %v59_v4 = vld [vmem:[#allocation2 + $0x110] sm:$0xff]  ;;  %v36_v5 = vld [vmem:[#allocation2 + $0x58] sm:$0xff]  ;;  %v62_v6 = vld [vmem:[#allocation2 + $0x128] sm:$0xff] }
  0x24   :  { %v35_v7 = vld [vmem:[#allocation2 + $0x50] sm:$0xff]  ;;  %v61_v8 = vld [vmem:[#allocation2 + $0x120] sm:$0xff]  ;;  %v38_v9 = vld [vmem:[#allocation2 + $0x68] sm:$0xff] }
  0x25   :  { %342 = vmatpush1.bf16.msra.mxu0 %v341_v17  ;;  %396 = vmatpush1.bf16.msra.mxu1 %v341_v17  ;;  %v64_v10 = vld [vmem:[#allocation2 + $0x138] sm:$0xff]  ;;  %v37_v11 = vld [vmem:[#allocation2 + $0x60] sm:$0xff]  ;;  %v63_v12 = vld [vmem:[#allocation2 + $0x130] sm:$0xff] }
  0x26   :  { %343 = vmatprep.subr.bf16.mxu0 %v439_v0  ;;  %381 = vmatprep.subr.bf16.mxu1 %v439_v0  ;;  %v40_v13 = vld [vmem:[#allocation2 + $0x78] sm:$0xff]  ;;  %v66_v14 = vld [vmem:[#allocation2 + $0x148] sm:$0xff]  ;;  %v39_v15 = vld [vmem:[#allocation2 + $0x70] sm:$0xff] }
  0x27   :  { %v65_v16 = vld [vmem:[#allocation2 + $0x140] sm:$0xff]  ;;  %v42_v17 = vld [vmem:[#allocation2 + $0x88] sm:$0xff]  ;;  %v68_v18 = vld [vmem:[#allocation2 + $0x158] sm:$0xff] }
  0x28   :  { %v41_v19 = vld [vmem:[#allocation2 + $0x80] sm:$0xff]  ;;  %v44_v21 = vld [vmem:[#allocation2 + $0x98] sm:$0xff]  ;;  %v70_v22 = vld [vmem:[#allocation2 + $0x168] sm:$0xff] }
  0x29   :  { %345 = vmatpush1.bf16.msra.mxu0 %v344_v20  ;;  %397 = vmatpush1.bf16.msra.mxu1 %v344_v20  ;;  %v67_v20 = vld [vmem:[#allocation2 + $0x150] sm:$0xff]  ;;  %v69_v24 = vld [vmem:[#allocation2 + $0x160] sm:$0xff]  ;;  %v46_v25 = vld [vmem:[#allocation2 + $0xa8] sm:$0xff] }
  0x2a   :  { %346 = vmatprep.subr.bf16.mxu0 %v439_v0  ;;  %382 = vmatprep.subr.bf16.mxu1 %v439_v0  ;;  %v45_v27 = vld [vmem:[#allocation2 + $0xa0] sm:$0xff]  ;;  %v71_v28 = vld [vmem:[#allocation2 + $0x170] sm:$0xff]  ;;  %v74_v30 = vld [vmem:[#allocation2 + $0x188] sm:$0xff] }
  0x2b   :  { %v47_v31 = vld [vmem:[#allocation2 + $0xb0] sm:$0xff]  ;;  %v50_v33 = vld [vmem:[#allocation2 + $0xc8] sm:$0xff]  ;;  %v49_v34 = vld [vmem:[#allocation2 + $0xc0] sm:$0xff] }
  0x2d   :  { %348 = vmatpush1.bf16.msra.mxu0 %v347_v23  ;;  %398 = vmatpush1.bf16.msra.mxu1 %v347_v23  ;;  %v43_v23 = vld [vmem:[#allocation2 + $0x90] sm:$0xff] }
  0x2e   :  { %349 = vmatprep.subr.bf16.mxu0 %v439_v0  ;;  %383 = vmatprep.subr.bf16.mxu1 %v439_v0 }
  0x31   :  { %351 = vmatpush1.bf16.msra.mxu0 %v350_v26  ;;  %399 = vmatpush1.bf16.msra.mxu1 %v350_v26  ;;  %v72_v26 = vld [vmem:[#allocation2 + $0x178] sm:$0xff] }
  0x32   :  { %352 = vmatprep.subr.bf16.mxu0 %v439_v0  ;;  %384 = vmatprep.subr.bf16.mxu1 %v439_v0 }
  0x35   :  { %354 = vmatpush1.bf16.msra.mxu0 %v353_v29  ;;  %400 = vmatpush1.bf16.msra.mxu1 %v353_v29  ;;  %v48_v29 = vld [vmem:[#allocation2 + $0xb8] sm:$0xff] }
  0x36   :  { %355 = vmatprep.subr.bf16.mxu0 %v439_v0  ;;  %385 = vmatprep.subr.bf16.mxu1 %v439_v0 }
  0x39   :  { %357 = vmatpush1.bf16.msra.mxu0 %v356_v32  ;;  %401 = vmatpush1.bf16.msra.mxu1 %v356_v32  ;;  %v73_v32 = vld [vmem:[#allocation2 + $0x180] sm:$0xff] }
  0x3a   :  { %358 = vmatprep.subr.bf16.mxu0 %v439_v0  ;;  %386 = vmatprep.subr.bf16.mxu1 %v439_v0 }
  0x3d   :  { %360 = vmatpush1.bf16.msra.mxu0 %v359_v35  ;;  %402 = vmatpush1.bf16.msra.mxu1 %v359_v35 }
  0x3e   :  { %361 = vmatprep.subr.bf16.mxu0 %v439_v0  ;;  %387 = vmatprep.subr.bf16.mxu1 %v439_v0 }
  0x41   :  { %363 = vmatpush1.bf16.msra.mxu0 %v362_v38  ;;  %403 = vmatpush1.bf16.msra.mxu1 %v362_v38 }
  0x42   :  { %364 = vmatprep.subr.bf16.mxu0 %v439_v0  ;;  %388 = vmatprep.subr.bf16.mxu1 %v439_v0 }
  0x45   :  { %366 = vmatpush1.bf16.msra.mxu0 %v365_v41  ;;  %404 = vmatpush1.bf16.msra.mxu1 %v365_v41 }
  0x46   :  { %367 = vmatprep.subr.bf16.mxu0 %v439_v0  ;;  %389 = vmatprep.subr.bf16.mxu1 %v439_v0 }
  0x49   :  { %369 = vmatpush1.bf16.msra.mxu0 %v368_v44  ;;  %405 = vmatpush1.bf16.msra.mxu1 %v368_v44 }
  0x4a   :  { %370 = vmatprep.subr.bf16.mxu0 %v439_v0  ;;  %390 = vmatprep.subr.bf16.mxu1 %v439_v0 }
  0x4d   :  { %372 = vmatpush1.bf16.msra.mxu0 %v371_v47  ;;  %406 = vmatpush1.bf16.msra.mxu1 %v371_v47 }
  0x4e   :  { %373 = vmatprep.subr.bf16.mxu0 %v439_v0  ;;  %391 = vmatprep.subr.bf16.mxu1 %v439_v0  ;;  %v57_v0 = vld [vmem:[#allocation2 + $0x100] sm:$0xff] }
  0x51   :  { %375 = vmatpush1.bf16.msra.mxu0 %v374_v50  ;;  %407 = vmatpush1.bf16.msra.mxu1 %v374_v50 }
  0x54   :  { %172 = vmatmul.mubr.f32.vlgmr.msra.gmra.mrb[0].mxu0 %v25_v51  ;;  %237 = vmatmul.mubr.f32.vlgmr.msra.gmra.mrb[0].mxu1 %v51_v52 }
  0x55   :  { %176 = vmatprep.mubr.f32.mxu0 %v28_v53  ;;  %241 = vmatprep.mubr.f32.mxu1 %v54_v54 }
  0x58   :  { %177 = vmatmul.mubr.f32.gmra.mrb[2].mxu0 %v27_v55  ;;  %242 = vmatmul.mubr.f32.gmra.mrb[2].mxu1 %v53_v56 }
  0x59   :  { %181 = vmatprep.mubr.f32.mxu0 %v30_v57  ;;  %246 = vmatprep.mubr.f32.mxu1 %v56_v58 }
  0x5c   :  { %182 = vmatmul.mubr.f32.gmra.mrb[4].mxu0 %v29_v59  ;;  %247 = vmatmul.mubr.f32.gmra.mrb[4].mxu1 %v55_v60 }
  0x5d   :  { %186 = vmatprep.mubr.f32.mxu0 %v32_v61  ;;  %251 = vmatprep.mubr.f32.mxu1 %v58_v62 }
  0x60   :  { %187 = vmatmul.mubr.f32.gmra.mrb[6].mxu0 %v31_v63  ;;  %252 = vmatmul.mubr.f32.gmra.mrb[6].mxu1 %v57_v0 }
  0x61   :  { %191 = vmatprep.mubr.f32.mxu0 %v34_v1  ;;  %256 = vmatprep.mubr.f32.mxu1 %v60_v2 }
  0x64   :  { %192 = vmatmul.mubr.f32.gmra.mrb[8].mxu0 %v33_v3  ;;  %257 = vmatmul.mubr.f32.gmra.mrb[8].mxu1 %v59_v4 }
  0x65   :  { %196 = vmatprep.mubr.f32.mxu0 %v36_v5  ;;  %261 = vmatprep.mubr.f32.mxu1 %v62_v6 }
  0x68   :  { %197 = vmatmul.mubr.f32.gmra.mrb[10].mxu0 %v35_v7  ;;  %262 = vmatmul.mubr.f32.gmra.mrb[10].mxu1 %v61_v8 }
  0x69   :  { %201 = vmatprep.mubr.f32.mxu0 %v38_v9  ;;  %266 = vmatprep.mubr.f32.mxu1 %v64_v10 }
  0x6c   :  { %202 = vmatmul.mubr.f32.gmra.mrb[12].mxu0 %v37_v11  ;;  %267 = vmatmul.mubr.f32.gmra.mrb[12].mxu1 %v63_v12 }
  0x6d   :  { %206 = vmatprep.mubr.f32.mxu0 %v40_v13  ;;  %271 = vmatprep.mubr.f32.mxu1 %v66_v14 }
  0x70   :  { %207 = vmatmul.mubr.f32.gmra.mrb[14].mxu0 %v39_v15  ;;  %272 = vmatmul.mubr.f32.gmra.mrb[14].mxu1 %v65_v16 }
  0x71   :  { %211 = vmatprep.mubr.f32.mxu0 %v42_v17  ;;  %276 = vmatprep.mubr.f32.mxu1 %v68_v18 }
  0x74   :  { %212 = vmatmul.mubr.f32.gmra.mrb[16].mxu0 %v41_v19  ;;  %277 = vmatmul.mubr.f32.gmra.mrb[16].mxu1 %v67_v20 }
  0x75   :  { %216 = vmatprep.mubr.f32.mxu0 %v44_v21  ;;  %281 = vmatprep.mubr.f32.mxu1 %v70_v22 }
  0x78   :  { %217 = vmatmul.mubr.f32.gmra.mrb[18].mxu0 %v43_v23  ;;  %282 = vmatmul.mubr.f32.gmra.mrb[18].mxu1 %v69_v24 }
  0x79   :  { %221 = vmatprep.mubr.f32.mxu0 %v46_v25  ;;  %286 = vmatprep.mubr.f32.mxu1 %v72_v26 }
  0x7c   :  { %222 = vmatmul.mubr.f32.gmra.mrb[20].mxu0 %v45_v27  ;;  %287 = vmatmul.mubr.f32.gmra.mrb[20].mxu1 %v71_v28 }
  0x7d   :  { %226 = vmatprep.mubr.f32.mxu0 %v48_v29  ;;  %291 = vmatprep.mubr.f32.mxu1 %v74_v30 }
  0x80   :  { %227 = vmatmul.mubr.f32.gmra.mrb[22].mxu0 %v47_v31  ;;  %292 = vmatmul.mubr.f32.gmra.mrb[22].mxu1 %v73_v32 }
  0x81   :  { %231 = vmatprep.mubr.f32.mxu0 %v50_v33 }
  0x84   :  { %232 = vmatmul.mubr.f32.gmra.mrb[24].mxu0 %v49_v34 }
 0x127   :  { %v173_v35 = vpop.f32.mrb[0].mxu0  ;;  %v238_v36 = vpop.f32.mrb[0].mxu1 }
 0x128   :  { %298 = vst.msk [vmem:[%s697_s2] sm:$0xff] %vm297_vm0, %v173_v35  ;;  %v175_v37 = vpop.f32.mrb[1].mxu0  ;;  %311 = vst.msk [vmem:[%s697_s2 + $0x68] sm:$0xff] %vm297_vm0, %v238_v36  ;;  %v240_v38 = vpop.f32.mrb[1].mxu1 }
 0x12b   :  { %v178_v39 = vpop.f32.mrb[2].mxu0  ;;  %v243_v40 = vpop.f32.mrb[2].mxu1 }
 0x12c   :  { %299 = vst.msk [vmem:[%s697_s2 + $0x8] sm:$0xff] %vm297_vm0, %v178_v39  ;;  %v180_v41 = vpop.f32.mrb[3].mxu0  ;;  %312 = vst.msk [vmem:[%s697_s2 + $0x70] sm:$0xff] %vm297_vm0, %v243_v40  ;;  %v245_v42 = vpop.f32.mrb[3].mxu1 }
 0x12f   :  { %v183_v43 = vpop.f32.mrb[4].mxu0  ;;  %v248_v44 = vpop.f32.mrb[4].mxu1 }
 0x130   :  { %300 = vst.msk [vmem:[%s697_s2 + $0x10] sm:$0xff] %vm297_vm0, %v183_v43  ;;  %v185_v45 = vpop.f32.mrb[5].mxu0  ;;  %313 = vst.msk [vmem:[%s697_s2 + $0x78] sm:$0xff] %vm297_vm0, %v248_v44  ;;  %v250_v46 = vpop.f32.mrb[5].mxu1 }
 0x133   :  { %v188_v47 = vpop.f32.mrb[6].mxu0  ;;  %v253_v48 = vpop.f32.mrb[6].mxu1 }
 0x134   :  { %301 = vst.msk [vmem:[%s697_s2 + $0x18] sm:$0xff] %vm297_vm0, %v188_v47  ;;  %v190_v49 = vpop.f32.mrb[7].mxu0  ;;  %314 = vst.msk [vmem:[%s697_s2 + $0x80] sm:$0xff] %vm297_vm0, %v253_v48  ;;  %v255_v50 = vpop.f32.mrb[7].mxu1 }
 0x137   :  { %v193_v51 = vpop.f32.mrb[8].mxu0  ;;  %v258_v52 = vpop.f32.mrb[8].mxu1 }
 0x138   :  { %302 = vst.msk [vmem:[%s697_s2 + $0x20] sm:$0xff] %vm297_vm0, %v193_v51  ;;  %v195_v53 = vpop.f32.mrb[9].mxu0  ;;  %315 = vst.msk [vmem:[%s697_s2 + $0x88] sm:$0xff] %vm297_vm0, %v258_v52  ;;  %v260_v54 = vpop.f32.mrb[9].mxu1 }
 0x13b   :  { %v198_v55 = vpop.f32.mrb[10].mxu0  ;;  %v263_v56 = vpop.f32.mrb[10].mxu1 }
 0x13c   :  { %303 = vst.msk [vmem:[%s697_s2 + $0x28] sm:$0xff] %vm297_vm0, %v198_v55  ;;  %v200_v57 = vpop.f32.mrb[11].mxu0  ;;  %316 = vst.msk [vmem:[%s697_s2 + $0x90] sm:$0xff] %vm297_vm0, %v263_v56  ;;  %v265_v58 = vpop.f32.mrb[11].mxu1 }
 0x13f   :  { %v203_v59 = vpop.f32.mrb[12].mxu0  ;;  %v268_v60 = vpop.f32.mrb[12].mxu1 }
 0x140   :  { %304 = vst.msk [vmem:[%s697_s2 + $0x30] sm:$0xff] %vm297_vm0, %v203_v59  ;;  %v205_v61 = vpop.f32.mrb[13].mxu0  ;;  %317 = vst.msk [vmem:[%s697_s2 + $0x98] sm:$0xff] %vm297_vm0, %v268_v60  ;;  %v270_v62 = vpop.f32.mrb[13].mxu1 }
 0x143   :  { %v208_v63 = vpop.f32.mrb[14].mxu0  ;;  %v273_v0 = vpop.f32.mrb[14].mxu1 }
 0x144   :  { %305 = vst.msk [vmem:[%s697_s2 + $0x38] sm:$0xff] %vm297_vm0, %v208_v63  ;;  %v210_v1 = vpop.f32.mrb[15].mxu0  ;;  %318 = vst.msk [vmem:[%s697_s2 + $0xa0] sm:$0xff] %vm297_vm0, %v273_v0  ;;  %v275_v2 = vpop.f32.mrb[15].mxu1 }
 0x147   :  { %v213_v3 = vpop.f32.mrb[16].mxu0  ;;  %v278_v4 = vpop.f32.mrb[16].mxu1 }
 0x148   :  { %306 = vst.msk [vmem:[%s697_s2 + $0x40] sm:$0xff] %vm297_vm0, %v213_v3  ;;  %v215_v5 = vpop.f32.mrb[17].mxu0  ;;  %319 = vst.msk [vmem:[%s697_s2 + $0xa8] sm:$0xff] %vm297_vm0, %v278_v4  ;;  %v280_v6 = vpop.f32.mrb[17].mxu1 }
 0x14b   :  { %v218_v7 = vpop.f32.mrb[18].mxu0  ;;  %v283_v8 = vpop.f32.mrb[18].mxu1 }
 0x14c   :  { %307 = vst.msk [vmem:[%s697_s2 + $0x48] sm:$0xff] %vm297_vm0, %v218_v7  ;;  %v220_v9 = vpop.f32.mrb[19].mxu0  ;;  %320 = vst.msk [vmem:[%s697_s2 + $0xb0] sm:$0xff] %vm297_vm0, %v283_v8  ;;  %v285_v10 = vpop.f32.mrb[19].mxu1 }
 0x14f   :  { %v223_v11 = vpop.f32.mrb[20].mxu0  ;;  %v288_v12 = vpop.f32.mrb[20].mxu1 }
 0x150   :  { %308 = vst.msk [vmem:[%s697_s2 + $0x50] sm:$0xff] %vm297_vm0, %v223_v11  ;;  %v225_v13 = vpop.f32.mrb[21].mxu0  ;;  %321 = vst.msk [vmem:[%s697_s2 + $0xb8] sm:$0xff] %vm297_vm0, %v288_v12  ;;  %v290_v14 = vpop.f32.mrb[21].mxu1 }
 0x153   :  { %v228_v15 = vpop.f32.mrb[22].mxu0  ;;  %v293_v16 = vpop.f32.mrb[22].mxu1 }
 0x154   :  { %309 = vst.msk [vmem:[%s697_s2 + $0x58] sm:$0xff] %vm297_vm0, %v228_v15  ;;  %v230_v17 = vpop.f32.mrb[23].mxu0  ;;  %322 = vst.msk [vmem:[%s697_s2 + $0xc0] sm:$0xff] %vm297_vm0, %v293_v16  ;;  %v295_v18 = vpop.f32.mrb[23].mxu1 }
 0x157   :  { %v233_v19 = vpop.f32.mrb[24].mxu0 }
 0x158   :  { %310 = vst.msk [vmem:[%s697_s2 + $0x60] sm:$0xff] %vm297_vm0, %v233_v19  ;;  %v235_v20 = vpop.f32.mrb[25].mxu0 }
 0x159   :  { %327 = vsyncpa [#allocation3], 1 }

</bundles_post_ra>
